<compile_context>
chip_gen: v7x
topology: tpu7x:2x2x1
jax: 0.10.0
libtpu: 0.0.40
codegen_flags: <defaults>
</compile_context>

<pallas_src>
import jax
import jax.numpy as jnp
import numpy as np
from jax import lax
from jax.experimental import pallas as pl
from jax.experimental.pallas import tpu as pltpu

INPUT_DIM = 13
HIDDEN_DIM = 64
OUTPUT_DIM = 3

PAD = 128      # lane-dense width for hidden layers / weight slab
K_PAD = 16     # input features padded 13 -> 16 (sublane-aligned, cheap)
OUT_PAD = 8    # output features padded 3 -> 8 (full last dim of the out array)
SUB = 256      # rows per in-kernel sub-block (bounds vreg live ranges)


def mlp_kernel(x_ref, w_ref, b_ref, o_ref):
    # x_ref: (TB, 16)   w_ref: (3, 128, 128)   b_ref: (8, 128)   o_ref: (TB, 8)
    tb = x_ref.shape[0]
    sub = SUB if (tb > SUB and tb % SUB == 0) else tb
    n_sub = tb // sub

    def body(s, carry):
        r0 = pl.multiple_of(s * sub, sub)
        x = x_ref[pl.ds(r0, sub), :]                                  # (sub, 16)
        # Layer 1: Linear(13->64) + ReLU. K=16 via an 8-aligned static slice of
        # the resident weight slab; padded rows/cols are exactly zero.
        h = jnp.dot(x, w_ref[0, :K_PAD, :],
                    preferred_element_type=jnp.float32) + b_ref[0:1, :]
        h = jnp.maximum(h, 0.0)
        # Layer 2: Linear(64->64) + ReLU.
        h = jnp.dot(h, w_ref[1], preferred_element_type=jnp.float32) + b_ref[1:2, :]
        h = jnp.maximum(h, 0.0)
        # Layer 3: Linear(64->3). Store only the 8 padded output lanes; the
        # (sub, 8) store spans the full last dim -> contiguous HBM writeback.
        out = jnp.dot(h, w_ref[2], preferred_element_type=jnp.float32) + b_ref[2:3, :]
        o_ref[pl.ds(r0, sub), :] = out[:, :OUT_PAD].astype(o_ref.dtype)
        return carry

    lax.fori_loop(0, n_sub, body, 0, unroll=True)


def pack_params(params):
    """Zero-pad and pack the 6 Linear params into 2 VMEM slabs (done once)."""
    def pad_w(w):
        return jnp.zeros((PAD, PAD), jnp.float32).at[:w.shape[0], :w.shape[1]].set(w)

    def pad_b(b):
        b = b.reshape(-1)
        return jnp.zeros((PAD,), jnp.float32).at[:b.shape[0]].set(b)

    w_slab = jnp.stack([pad_w(params["w1"]), pad_w(params["w2"]), pad_w(params["w3"])])
    b_slab = jnp.zeros((8, PAD), jnp.float32)
    b_slab = b_slab.at[0].set(pad_b(params["b1"]))
    b_slab = b_slab.at[1].set(pad_b(params["b2"]))
    b_slab = b_slab.at[2].set(pad_b(params["b3"]))
    return w_slab, b_slab


def _round_up(n, m):
    return ((n + m - 1) // m) * m


def _tile_batch(batch, max_tb=1024):
    """Pick (batch_tile, padded_batch)."""
    if batch <= 256:
        # Tiny-batch path: single grid step, 8-row round-up. Wall time here is
        # launch/weight-DMA fixed cost; amortize across calls at the call site.
        tb = max(8, _round_up(batch, 8))
        return tb, tb
    # Tiles are multiples of SUB (so the in-kernel sub-block loop divides
    # evenly), capped at max_tb; keep an even number of grid steps so the
    # "parallel" batch axis splits evenly across both v7x TensorCores.
    tb = min(max_tb, _round_up(pl.cdiv(batch, 2), SUB))
    n_tiles = pl.cdiv(batch, tb)
    n_tiles += n_tiles % 2
    return tb, n_tiles * tb


def mock_policy_network_forward(x, w_slab, b_slab, *, block_b=1024):
    """x: (B, 13) f32.  w_slab: (3, 128, 128).  b_slab: (8, 128)."""
    batch, in_dim = x.shape
    tb, b_pad = _tile_batch(batch, block_b)
    # Zero-pad features 13 -> 16 lanes and batch -> b_pad rows. Exact: padded
    # rows/cols only ever meet zero weights/biases and are sliced off below.
    x_p = jnp.zeros((b_pad, K_PAD), jnp.float32).at[:batch, :in_dim].set(x)

    out = pl.pallas_call(
        mlp_kernel,
        out_shape=jax.ShapeDtypeStruct((b_pad, OUT_PAD), jnp.float32),
        grid_spec=pltpu.PrefetchScalarGridSpec(
            num_scalar_prefetch=0,
            grid=(b_pad // tb,),
            in_specs=[
                pl.BlockSpec((tb, K_PAD), lambda i: (i, 0)),        # x tile
                pl.BlockSpec((3, PAD, PAD), lambda i: (0, 0, 0)),   # weights (VMEM-resident)
                pl.BlockSpec((8, PAD), lambda i: (0, 0)),           # biases (VMEM-resident)
            ],
            out_specs=pl.BlockSpec((tb, OUT_PAD), lambda i: (i, 0)),
        ),
        compiler_params=pltpu.CompilerParams(
            dimension_semantics=("parallel",)),
    )(x_p, w_slab, b_slab)
    return out[:batch, :OUTPUT_DIM]


def init_params(key, input_dim=INPUT_DIM, hidden_dim=HIDDEN_DIM, output_dim=OUTPUT_DIM):
    """Deterministic init mimicking nn.Linear's uniform(-1/sqrt(fan_in), ...)."""
    ks = jax.random.split(key, 6)

    def linear(kw, kb, fan_in, fan_out):
        bound = 1.0 / np.sqrt(fan_in)
        w = jax.random.uniform(kw, (fan_in, fan_out), jnp.float32, -bound, bound)
        b = jax.random.uniform(kb, (1, fan_out), jnp.float32, -bound, bound)
        return w, b

    w1, b1 = linear(ks[0], ks[1], input_dim, hidden_dim)
    w2, b2 = linear(ks[2], ks[3], hidden_dim, hidden_dim)
    w3, b3 = linear(ks[4], ks[5], hidden_dim, output_dim)
    return {"w1": w1, "b1": b1, "w2": w2, "b2": b2, "w3": w3, "b3": b3}


def reference_forward(x, p):
    h = jnp.maximum(x @ p["w1"] + p["b1"], 0.0)
    h = jnp.maximum(h @ p["w2"] + p["b2"], 0.0)
    return h @ p["w3"] + p["b3"]


if __name__ == "__main__":
    key = jax.random.PRNGKey(0)
    k_params, k_x = jax.random.split(key)

    params = init_params(k_params)
    w_slab, b_slab = pack_params(params)          # packed/padded once (host side)

    # Small batch: single-tile path (TB=8, grid=1).
    x = jax.random.normal(k_x, (8, INPUT_DIM), dtype=jnp.float32)
    out = jax.block_until_ready(mock_policy_network_forward(x, w_slab, b_slab))
    ref = reference_forward(x, params)
    assert out.shape == (8, OUTPUT_DIM)
    np.testing.assert_allclose(np.asarray(out), np.asarray(ref), rtol=1e-5, atol=1e-5)

    # Larger batch: exercises the multi-tile grid (TB=512, 2 parallel steps) and
    # the in-kernel 256-row sub-block loop.
    xb = jax.random.normal(jax.random.PRNGKey(1), (600, INPUT_DIM), dtype=jnp.float32)
    outb = jax.block_until_ready(mock_policy_network_forward(xb, w_slab, b_slab))
    np.testing.assert_allclose(np.asarray(outb),
                               np.asarray(reference_forward(xb, params)),
                               rtol=1e-5, atol=1e-5)

    print("KERNEL_OK")
</pallas_src>

<mosaic_0001>
module attributes {stable_mosaic.version = 11 : i64} {
  func.func @mlp_kernel(%arg0: i32, %arg1: memref<8x16xf32, #tpu.memory_space<vmem>>, %arg2: memref<3x128x128xf32, #tpu.memory_space<vmem>>, %arg3: memref<8x128xf32, #tpu.memory_space<vmem>>, %arg4: memref<8x8xf32, #tpu.memory_space<vmem>>) attributes {dimension_semantics = [#tpu.dimension_semantics<parallel>], iteration_bounds = array<i64: 1>, scalar_prefetch = 0 : i64, scratch_operands = 0 : i64, tpu.core_type = #tpu.core_type<tc>, window_params = [{transform_indices = @transform_0, window_bounds = array<i64: 8, 16>}, {pipeline_mode = #tpu.pipeline_mode<synchronous>, transform_indices = @transform_1, window_bounds = array<i64: 3, 128, 128>}, {pipeline_mode = #tpu.pipeline_mode<synchronous>, transform_indices = @transform_2, window_bounds = array<i64: 8, 128>}, {transform_indices = @transform_3, window_bounds = array<i64: 8, 8>}]} {
    %c0_i32 = arith.constant 0 : i32
    %c8_i32 = arith.constant 8 : i32
    %0 = arith.muli %c0_i32, %c8_i32 : i32
    %1 = tpu.assume_multiple %0, 8 : i32
    %2 = arith.index_cast %1 : i32 to index
    %c0 = arith.constant 0 : index
    %3 = vector.load %arg1[%2, %c0] : memref<8x16xf32, #tpu.memory_space<vmem>>, vector<8x16xf32>
    %c0_0 = arith.constant 0 : index
    %c0_1 = arith.constant 0 : index
    %c0_2 = arith.constant 0 : index
    %4 = vector.load %arg2[%c0_0, %c0_1, %c0_2] : memref<3x128x128xf32, #tpu.memory_space<vmem>>, vector<1x16x128xf32>
    %5 = vector.shape_cast %4 : vector<1x16x128xf32> to vector<16x128xf32>
    %cst = arith.constant dense<0.000000e+00> : vector<8x128xf32>
    %6 = tpu.matmul %3, %5, %cst {dimension_numbers = #tpu.dot_dimension_numbers<[1], [0], [0], [1], [0, 0, 1, 1], [], []>} : vector<8x16xf32>, vector<16x128xf32>, vector<8x128xf32> -> vector<8x128xf32>
    %c0_3 = arith.constant 0 : index
    %c0_4 = arith.constant 0 : index
    %7 = vector.load %arg3[%c0_3, %c0_4] : memref<8x128xf32, #tpu.memory_space<vmem>>, vector<1x128xf32>
    %8 = vector.broadcast %7 : vector<1x128xf32> to vector<8x128xf32>
    %9 = arith.addf %6, %8 : vector<8x128xf32>
    %cst_5 = arith.constant 0.000000e+00 : f32
    %10 = vector.broadcast %cst_5 : f32 to vector<8x128xf32>
    %11 = arith.maximumf %9, %10 : vector<8x128xf32>
    %c1 = arith.constant 1 : index
    %c0_6 = arith.constant 0 : index
    %c0_7 = arith.constant 0 : index
    %12 = vector.load %arg2[%c1, %c0_6, %c0_7] : memref<3x128x128xf32, #tpu.memory_space<vmem>>, vector<1x128x128xf32>
    %13 = vector.shape_cast %12 : vector<1x128x128xf32> to vector<128x128xf32>
    %cst_8 = arith.constant dense<0.000000e+00> : vector<8x128xf32>
    %14 = tpu.matmul %11, %13, %cst_8 {dimension_numbers = #tpu.dot_dimension_numbers<[1], [0], [0], [1], [0, 0, 1, 1], [], []>} : vector<8x128xf32>, vector<128x128xf32>, vector<8x128xf32> -> vector<8x128xf32>
    %c1_9 = arith.constant 1 : index
    %c0_10 = arith.constant 0 : index
    %15 = vector.load %arg3[%c1_9, %c0_10] : memref<8x128xf32, #tpu.memory_space<vmem>>, vector<1x128xf32>
    %16 = vector.broadcast %15 : vector<1x128xf32> to vector<8x128xf32>
    %17 = arith.addf %14, %16 : vector<8x128xf32>
    %cst_11 = arith.constant 0.000000e+00 : f32
    %18 = vector.broadcast %cst_11 : f32 to vector<8x128xf32>
    %19 = arith.maximumf %17, %18 : vector<8x128xf32>
    %c2 = arith.constant 2 : index
    %c0_12 = arith.constant 0 : index
    %c0_13 = arith.constant 0 : index
    %20 = vector.load %arg2[%c2, %c0_12, %c0_13] : memref<3x128x128xf32, #tpu.memory_space<vmem>>, vector<1x128x128xf32>
    %21 = vector.shape_cast %20 : vector<1x128x128xf32> to vector<128x128xf32>
    %cst_14 = arith.constant dense<0.000000e+00> : vector<8x128xf32>
    %22 = tpu.matmul %19, %21, %cst_14 {dimension_numbers = #tpu.dot_dimension_numbers<[1], [0], [0], [1], [0, 0, 1, 1], [], []>} : vector<8x128xf32>, vector<128x128xf32>, vector<8x128xf32> -> vector<8x128xf32>
    %c2_15 = arith.constant 2 : index
    %c0_16 = arith.constant 0 : index
    %23 = vector.load %arg3[%c2_15, %c0_16] : memref<8x128xf32, #tpu.memory_space<vmem>>, vector<1x128xf32>
    %24 = vector.broadcast %23 : vector<1x128xf32> to vector<8x128xf32>
    %25 = arith.addf %22, %24 : vector<8x128xf32>
    %26 = vector.extract_strided_slice %25 {offsets = [0, 0], sizes = [8, 8], strides = [1, 1]} : vector<8x128xf32> to vector<8x8xf32>
    %27 = arith.index_cast %1 : i32 to index
    %c0_17 = arith.constant 0 : index
    %28 = vector.load %arg4[%27, %c0_17] : memref<8x8xf32, #tpu.memory_space<vmem>>, vector<8x8xf32>
    tpu.vector_store %arg4[%27, %c0_17], %26 {strides = array<i32>} : memref<8x8xf32, #tpu.memory_space<vmem>>, vector<8x8xf32>,
    %c1_i32 = arith.constant 1 : i32
    return
  }
  func.func @transform_0(%arg0: i32) -> (i32, i32) {
    %c0_i32 = arith.constant 0 : i32
    %c0_i32_0 = arith.constant 0 : i32
    return %arg0, %c0_i32 : i32, i32
  }
  func.func @transform_1(%arg0: i32) -> (i32, i32, i32) {
    %c0_i32 = arith.constant 0 : i32
    %c0_i32_0 = arith.constant 0 : i32
    %c0_i32_1 = arith.constant 0 : i32
    %c0_i32_2 = arith.constant 0 : i32
    return %c0_i32, %c0_i32_0, %c0_i32_1 : i32, i32, i32
  }
  func.func @transform_2(%arg0: i32) -> (i32, i32) {
    %c0_i32 = arith.constant 0 : i32
    %c0_i32_0 = arith.constant 0 : i32
    %c0_i32_1 = arith.constant 0 : i32
    return %c0_i32, %c0_i32_0 : i32, i32
  }
  func.func @transform_3(%arg0: i32) -> (i32, i32) {
    %c0_i32 = arith.constant 0 : i32
    %c0_i32_0 = arith.constant 0 : i32
    return %arg0, %c0_i32 : i32, i32
  }
}

</mosaic_0001>

<bundles_post_ra>
// kernel: tpu_custom_call.1
= control target key start
LH: loop header
LB: loop body
LE: loop exit
PB: predicated region body
PF: predicated region fallthrough
CT: control target
= control target key end

     0   :  { %8 = vsyncpa [#allocation3], 0  ;;  %s707_s0 = inlined_call_operand.hbm [shape: f32[8,16], index: 0, kind: input, shape index: {}]   ;;  %s708_s1 = inlined_call_operand.hbm [shape: f32[3,128,128], index: 1, kind: input, shape index: {}]   ;;  %s709_s2 = inlined_call_operand.hbm [shape: f32[8,128], index: 2, kind: input, shape index: {}]   ;;  %s710_s3 = inlined_call_operand.hbm [shape: f32[8,8], index: 3, kind: output, shape index: {}]  }
   0x1   :  { %9 = vsyncpa [#allocation6], 0 }
   0x2   :  { %10 = vsyncpa [#allocation4], 0  ;;  %s610_s12 = smov [#allocation5]   ;;  %s516_s16 = scalar_lea.hbm %s708_s1, 6144 }
   0x3   :  { %s26_s13 = sshll.u32 %s610_s12, 4  ;;  %p517_p0 = scmp.ne.s32.totalorder %s708_s1, %s516_s16  ;;  %s27_s13 = int_to_ptr.vmem [resolvable:$true] %s26_s13 }
   0x4   :  { %p520_p1 = scmp.lt.u32.totalorder %s516_s16, %s708_s1 }
   0x6   :  { %p522_p2 = pnand %p520_p1, %p517_p0 }
   0x8   :  { %525 = shalt.err (!%p522_p2)
}
   0x9   :  { %s526_s21 = scalar_lea.vmem %s27_s13, 6144  ;;  %p531_p4 = scmp.lt.s32.totalorder %s27_s13, %s27_s13 }
   0xa   :  { %p527_p3 = scmp.ne.s32.totalorder %s27_s13, %s526_s21  ;;  %p532_p5 = scmp.lt.s32.totalorder %s526_s21, %s526_s21 }
   0xc   :  { %p533_p6 = por %p532_p5, %p531_p4 }
   0xe   :  { %p534_p7 = pnand %p533_p6, %p527_p3 }
  0x10   :  { %537 = shalt.err (!%p534_p7)
}
  0x11   :  { %s611_s22 = smov 128   ;;  %s612_s23 = smov 8  }
  0x12   :  { %32 = dma.hbm_to_vmem [thread:$0]  %s708_s1, 6144, %s27_s13, [#allocation6], %s611_s22, %s611_s22, %s612_s23  }
  0x13   :  { %s613_s26 = smov [#allocation2]   ;;  %s614_s28 = smov [#allocation7]  }
  0x14   :  { %s17_s27 = sshll.u32 %s613_s26, 4  ;;  %s39_s29 = sshll.u32 %s614_s28, 4  ;;  %s18_s27 = int_to_ptr.vmem [resolvable:$true] %s17_s27  ;;  %s40_s29 = int_to_ptr.vmem [resolvable:$true] %s39_s29 }
  0x15   :  { %s538_s5 = scalar_lea.hbm %s707_s0, 128 }
  0x16   :  { %p539_p8 = scmp.ne.s32.totalorder %s707_s0, %s538_s5  ;;  %p542_p9 = scmp.lt.u32.totalorder %s538_s5, %s707_s0 }
  0x18   :  { %p544_p10 = pnand %p542_p9, %p539_p8 }
  0x1a   :  { %547 = shalt.err (!%p544_p10)
}
  0x1b   :  { %s548_s1 = scalar_lea.vmem %s18_s27, 128  ;;  %p553_p12 = scmp.lt.s32.totalorder %s18_s27, %s18_s27 }
  0x1c   :  { %p549_p11 = scmp.ne.s32.totalorder %s18_s27, %s548_s1  ;;  %p554_p13 = scmp.lt.s32.totalorder %s548_s1, %s548_s1 }
  0x1e   :  { %p555_p0 = por %p554_p13, %p553_p12 }
  0x20   :  { %p556_p1 = pnand %p555_p0, %p549_p11 }
  0x22   :  { %559 = shalt.err (!%p556_p1)
}
  0x23   :  { %20 = dma.hbm_to_vmem [thread:$0]  %s707_s0, 128, %s18_s27, [#allocation3]  }
  0x24   :  { %s560_s14 = scalar_lea.hbm %s709_s2, 128 }
  0x25   :  { %p561_p2 = scmp.ne.s32.totalorder %s709_s2, %s560_s14  ;;  %p564_p3 = scmp.lt.u32.totalorder %s560_s14, %s709_s2 }
  0x27   :  { %p566_p4 = pnand %p564_p3, %p561_p2 }
  0x29   :  { %569 = shalt.err (!%p566_p4)
}
  0x2a   :  { %s570_s19 = scalar_lea.vmem %s40_s29, 128  ;;  %p575_p6 = scmp.lt.s32.totalorder %s40_s29, %s40_s29 }
  0x2b   :  { %p571_p5 = scmp.ne.s32.totalorder %s40_s29, %s570_s19  ;;  %p576_p7 = scmp.lt.s32.totalorder %s570_s19, %s570_s19 }
  0x2d   :  { %p577_p8 = por %p576_p7, %p575_p6 }
  0x2f   :  { %p578_p9 = pnand %p577_p8, %p571_p5 }
  0x31   :  { %581 = shalt.err (!%p578_p9)
}
  0x32   :  { %42 = dma.hbm_to_vmem [thread:$0]  %s709_s2, 128, %s40_s29, [#allocation6]  }
  0x33   :  { %604 = dma.done.wait [#allocation3], 128  }
  0x34   :  { %605 = vsyncadd [#allocation3], 4294967168 }
  0x35   :  { %606 = dma.done.wait [#allocation6], 6272  }
  0x36   :  { %607 = vsyncadd [#allocation6], 4294961024  ;;  %v615_v0 = vmov 0.0|0.0   ;;  %vm616_vm0 = vmmov 0   ;;  %v617_v1 = vmov 0.0   ;;  %v53_v2 = vld [vmem:[#allocation5] sm:$0xff] }
  0x37   :  { %456 = vmatprep.subr.bf16.mxu0 %v615_v0  ;;  %383 = vmatprep.mubr.msk.f32.mxu0 %vm616_vm0, %v617_v1  ;;  %v54_v3 = vld [vmem:[#allocation5 + $0x8] sm:$0xff]  ;;  %v136_v5 = vld [vmem:[#allocation5 + $0x80] sm:$0xff]  ;;  %v138_v7 = vld [vmem:[#allocation5 + $0x90] sm:$0xff]  ;;  %vm60_vm1 = vcmask 130048   ;;  %s618_s2 = smov [#allocation8]   ;;  %vm320_vm2 = vcmask 64512  }
  0x38   :  { %459 = vmatprep.subr.bf16.mxu1 %v615_v0  ;;  %418 = vmatprep.mubr.msk.f32.mxu1 %vm616_vm0, %v617_v1  ;;  %v457_v4 = vpack.c.bf16 %v54_v3, %v53_v2  ;;  %v137_v6 = vld [vmem:[#allocation5 + $0x88] sm:$0xff]  ;;  %v139_v9 = vld [vmem:[#allocation5 + $0x98] sm:$0xff]  ;;  %v140_v12 = vld [vmem:[#allocation5 + $0xa0] sm:$0xff]  ;;  %s328_s21 = sshll.u32 %s618_s2, 4  ;;  %s329_s21 = int_to_ptr.vmem [resolvable:$true] %s328_s21 }
  0x39   :  { %v460_v8 = vpack.c.bf16 %v137_v6, %v136_v5  ;;  %v52_v10 = vld [vmem:[#allocation2] sm:$0xff]  ;;  %v463_v11 = vpack.c.bf16 %v139_v9, %v138_v7  ;;  %v141_v13 = vld [vmem:[#allocation5 + $0xa8] sm:$0xff]  ;;  %v142_v15 = vld [vmem:[#allocation5 + $0xb0] sm:$0xff]  ;;  %s582_s22 = scalar_lea.vmem %s329_s21, 128  ;;  %p587_p11 = scmp.lt.s32.totalorder %s329_s21, %s329_s21 }
  0x3a   :  { %458 = vmatpush3.bf16.msra.mxu0 %v457_v4  ;;  %v466_v14 = vpack.c.bf16 %v141_v13, %v140_v12  ;;  %v143_v16 = vld [vmem:[#allocation5 + $0xb8] sm:$0xff]  ;;  %v144_v18 = vld [vmem:[#allocation5 + $0xc0] sm:$0xff]  ;;  %v145_v19 = vld [vmem:[#allocation5 + $0xc8] sm:$0xff]  ;;  %p583_p10 = scmp.ne.s32.totalorder %s329_s21, %s582_s22  ;;  %p588_p12 = scmp.lt.s32.totalorder %s582_s22, %s582_s22 }
  0x3b   :  { %461 = vmatpush3.bf16.msra.mxu1 %v460_v8  ;;  %483 = vmatprep.subr.bf16.mxu0 %v615_v0  ;;  %v469_v17 = vpack.c.bf16 %v143_v16, %v142_v15  ;;  %v472_v20 = vpack.c.bf16 %v145_v19, %v144_v18  ;;  %v146_v21 = vld [vmem:[#allocation5 + $0xd0] sm:$0xff]  ;;  %v147_v22 = vld [vmem:[#allocation5 + $0xd8] sm:$0xff]  ;;  %v148_v24 = vld [vmem:[#allocation5 + $0xe0] sm:$0xff] }
  0x3c   :  { %462 = vmatprep.subr.bf16.mxu1 %v615_v0  ;;  %v475_v23 = vpack.c.bf16 %v147_v22, %v146_v21  ;;  %v149_v25 = vld [vmem:[#allocation5 + $0xe8] sm:$0xff]  ;;  %v150_v27 = vld [vmem:[#allocation5 + $0xf0] sm:$0xff]  ;;  %v151_v28 = vld [vmem:[#allocation5 + $0xf8] sm:$0xff]  ;;  %p589_p13 = por %p588_p12, %p587_p11 }
  0x3d   :  { %384 = vmatmul.mubr.msk.f32.vlgmr.msra.gmra.mrb[0].mxu0 %vm60_vm1, %v52_v10  ;;  %v478_v26 = vpack.c.bf16 %v149_v25, %v148_v24  ;;  %v481_v29 = vpack.c.bf16 %v151_v28, %v150_v27  ;;  %v229_v30 = vld [vmem:[#allocation5 + $0x100] sm:$0xff]  ;;  %v230_v31 = vld [vmem:[#allocation5 + $0x108] sm:$0xff]  ;;  %v231_v32 = vld [vmem:[#allocation5 + $0x110] sm:$0xff] }
  0x3e   :  { %453 = vmatprep.mubr.msk.f32.mxu0 %vm616_vm0, %v617_v1  ;;  %v484_v33 = vpack.c.bf16 %v230_v31, %v229_v30  ;;  %v232_v34 = vld [vmem:[#allocation5 + $0x118] sm:$0xff]  ;;  %v233_v36 = vld [vmem:[#allocation5 + $0x120] sm:$0xff]  ;;  %v234_v37 = vld [vmem:[#allocation5 + $0x128] sm:$0xff]  ;;  %p590_p0 = pnand %p589_p13, %p583_p10 }
  0x3f   :  { %464 = vmatpush3.bf16.msra.mxu1 %v463_v11  ;;  %v487_v35 = vpack.c.bf16 %v232_v34, %v231_v32  ;;  %v490_v38 = vpack.c.bf16 %v234_v37, %v233_v36  ;;  %v235_v39 = vld [vmem:[#allocation5 + $0x130] sm:$0xff]  ;;  %v236_v40 = vld [vmem:[#allocation5 + $0x138] sm:$0xff]  ;;  %v237_v42 = vld [vmem:[#allocation5 + $0x140] sm:$0xff] }
  0x40   :  { %465 = vmatprep.subr.bf16.mxu1 %v615_v0  ;;  %485 = vmatpush3.bf16.msra.mxu0 %v484_v33  ;;  %v493_v41 = vpack.c.bf16 %v236_v40, %v235_v39  ;;  %v238_v43 = vld [vmem:[#allocation5 + $0x148] sm:$0xff]  ;;  %v239_v45 = vld [vmem:[#allocation5 + $0x150] sm:$0xff]  ;;  %v240_v46 = vld [vmem:[#allocation5 + $0x158] sm:$0xff] }
  0x41   :  { %486 = vmatprep.subr.bf16.mxu0 %v615_v0  ;;  %v496_v44 = vpack.c.bf16 %v238_v43, %v237_v42  ;;  %v499_v47 = vpack.c.bf16 %v240_v46, %v239_v45  ;;  %v241_v48 = vld [vmem:[#allocation5 + $0x160] sm:$0xff]  ;;  %v242_v49 = vld [vmem:[#allocation5 + $0x168] sm:$0xff]  ;;  %v243_v56 = vld [vmem:[#allocation5 + $0x170] sm:$0xff] }
  0x42   :  { %v502_v50 = vpack.c.bf16 %v242_v49, %v241_v48  ;;  %v338_v51 = vld [vmem:[#allocation7] ss:$0 sm:$0xff]  ;;  %v244_v57 = vld [vmem:[#allocation5 + $0x178] sm:$0xff]  ;;  %v340_v59 = vld [vmem:[#allocation7 + $0x1] ss:$0 sm:$0xff] }
  0x43   :  { %467 = vmatpush3.bf16.msra.mxu1 %v466_v14  ;;  %v505_v58 = vpack.c.bf16 %v244_v57, %v243_v56  ;;  %v341_v1 = vld [vmem:[#allocation7 + $0x2] ss:$0 sm:$0xff] }
  0x44   :  { %468 = vmatprep.subr.bf16.mxu1 %v615_v0  ;;  %488 = vmatpush3.bf16.msra.mxu0 %v487_v35 }
  0x45   :  { %489 = vmatprep.subr.bf16.mxu0 %v615_v0 }
  0x47   :  { %470 = vmatpush3.bf16.msra.mxu1 %v469_v17 }
  0x48   :  { %471 = vmatprep.subr.bf16.mxu1 %v615_v0  ;;  %491 = vmatpush3.bf16.msra.mxu0 %v490_v38 }
  0x49   :  { %492 = vmatprep.subr.bf16.mxu0 %v615_v0 }
  0x4b   :  { %473 = vmatpush3.bf16.msra.mxu1 %v472_v20 }
  0x4c   :  { %474 = vmatprep.subr.bf16.mxu1 %v615_v0  ;;  %494 = vmatpush3.bf16.msra.mxu0 %v493_v41 }
  0x4d   :  { %495 = vmatprep.subr.bf16.mxu0 %v615_v0 }
  0x4f   :  { %476 = vmatpush3.bf16.msra.mxu1 %v475_v23 }
  0x50   :  { %477 = vmatprep.subr.bf16.mxu1 %v615_v0  ;;  %497 = vmatpush3.bf16.msra.mxu0 %v496_v44 }
  0x51   :  { %498 = vmatprep.subr.bf16.mxu0 %v615_v0 }
  0x53   :  { %479 = vmatpush3.bf16.msra.mxu1 %v478_v26 }
  0x54   :  { %480 = vmatprep.subr.bf16.mxu1 %v615_v0  ;;  %500 = vmatpush3.bf16.msra.mxu0 %v499_v47 }
  0x55   :  { %501 = vmatprep.subr.bf16.mxu0 %v615_v0 }
  0x57   :  { %482 = vmatpush3.bf16.msra.mxu1 %v481_v29 }
  0x58   :  { %503 = vmatpush3.bf16.msra.mxu0 %v502_v50 }
  0x59   :  { %504 = vmatprep.subr.bf16.mxu0 %v615_v0 }
  0x5c   :  { %506 = vmatpush3.bf16.msra.mxu0 %v505_v58 }
 0x110   :  { %v130_v52 = vpop.f32.mrb[0].mxu0 }
 0x111   :  { %v131_v53 = vadd.f32 %v338_v51, %v130_v52  ;;  %v385_v54 = vpop.f32.mrb[1].mxu0 }
 0x113   :  { %v134_v55 = vmax.f32 %v131_v53, 0.0 }
 0x115   :  { %419 = vmatmul.mubr.f32.vlgmr.msra.gmra.mrb[0].mxu1 %v134_v55 }
 0x1e8   :  { %v223_v60 = vpop.f32.mrb[0].mxu1 }
 0x1e9   :  { %v224_v61 = vadd.f32 %v340_v59, %v223_v60  ;;  %v420_v62 = vpop.f32.mrb[1].mxu1 }
 0x1eb   :  { %v227_v63 = vmax.f32 %v224_v61, 0.0 }
 0x1ed   :  { %454 = vmatmul.mubr.f32.vlgmr.msra.gmra.mrb[2].mxu0 %v227_v63 }
 0x2c0   :  { %v316_v0 = vpop.f32.mrb[2].mxu0 }
 0x2c1   :  { %v317_v2 = vadd.f32 %v341_v1, %v316_v0  ;;  %v455_v3 = vpop.f32.mrb[3].mxu0 }
 0x2c3   :  { %321 = vst.msk [vmem:[#allocation8] sm:$0xff] %vm320_vm2, %v317_v2 }
 0x2c4   :  { %593 = shalt.err (!%p590_p0)
}
 0x2c5   :  { %s594_s25 = scalar_lea.hbm %s710_s3, 128 }
 0x2c6   :  { %p595_p1 = scmp.ne.s32.totalorder %s710_s3, %s594_s25  ;;  %p598_p2 = scmp.lt.u32.totalorder %s594_s25, %s710_s3 }
 0x2c8   :  { %p600_p3 = pnand %p598_p2, %p595_p1 }
 0x2ca   :  { %603 = shalt.err (!%p600_p3)
}
 0x2cb   :  { %331 = dma.vmem_to_hbm [thread:$0]  %s329_s21, 128, %s710_s3, [#allocation4]  }
 0x2cc   :  { %608 = dma.done.wait [#allocation4], 128  }
 0x2cd   :  { %609 = vsyncadd [#allocation4], 4294967168 }
 0x2ce   :  { %335 = vsyncpa [#allocation3], 1 }
 0x2cf   :  { %336 = vsyncpa [#allocation6], 1 }
 0x2d0   :  { %337 = vsyncpa [#allocation4], 1 }

</bundles_post_ra>
